<compile_context>
chip_gen: v5e
topology: v5e:2x2
jax: 0.10.0
libtpu: 0.0.40
codegen_flags: <defaults>
</compile_context>

<pallas_src>
import math

import jax
import jax.numpy as jnp
from jax.experimental import pallas as pl
from jax.experimental.pallas import tpu as pltpu


# --------------------------------------------------------------------------- kernel

def _pos_enc_kernel(x_ref, pe_ref, o_ref):
    # x_ref / o_ref: (TR, TL) tile of the flattened activations.
    # pe_ref:        (1, TL) tile (row-broadcast) or (TR, TL) tile (folded layout).
    # Accumulate in f32 so bf16 activations + f32 pe match PyTorch promotion exactly.
    x = x_ref[...].astype(jnp.float32)
    pe = pe_ref[...].astype(jnp.float32)
    o_ref[...] = (x + pe).astype(o_ref.dtype)


# ------------------------------------------------------------------ pe construction

def make_positional_encoding(max_seq_len: int, d_model: int,
                             dtype=jnp.float32) -> jnp.ndarray:
    """Sinusoidal pe buffer, matching the PyTorch __init__ (registered f32 buffer)."""
    position = jnp.arange(max_seq_len, dtype=jnp.float32)[:, None]          # [L, 1]
    exp_input = jnp.arange(0, d_model, 2, dtype=jnp.float32) * (
        -math.log(10000.0) / d_model)
    div_term = jnp.exp(exp_input)                                            # [ceil(D/2)]
    angles = position * div_term                                             # [L, ceil(D/2)]
    pe = jnp.zeros((max_seq_len, d_model), dtype=jnp.float32)
    pe = pe.at[:, 0::2].set(jnp.sin(angles))
    # Slice keeps odd d_model from shape-mismatching (even d_model: no-op slice).
    pe = pe.at[:, 1::2].set(jnp.cos(angles)[:, : d_model // 2])
    return pe.astype(dtype)                                                  # [L, D]


# ------------------------------------------------------------------------- helpers

def _round_up(n: int, m: int) -> int:
    return ((n + m - 1) // m) * m


def _round_down(n: int, m: int) -> int:
    return (n // m) * m


def _vmem_capacity_bytes() -> int:
    """Per-core VMEM capacity; gen-aware cap for vmem_limit_bytes."""
    try:
        cap = int(getattr(pltpu.get_tpu_info(), "vmem_capacity_bytes"))
    except Exception:
        cap = 64 << 20          # v7x per-TC physical; safe lower bound for v5e/v6e
    return max(cap, 32 << 20)


def _padded_block_bytes(rows: int, lanes: int, dtype) -> int:
    """VMEM footprint of one block after (sublane, lane) tiling/padding."""
    its = jnp.dtype(dtype).itemsize
    sub = max(8, 32 // its)     # native sublane tiling: 8 f32 / 16 bf16 / 32 int8
    return _round_up(rows, sub) * _round_up(lanes, 128) * its


def _choose_fold(batch: int, seq_len: int, pack: int):
    """Pick k (multiple-of-8 divisor of S, >= pack) to fold S into rows when B < pack."""
    if batch >= pack:
        return None
    for align in (pack, 8):
        k = align
        while k <= seq_len:
            if seq_len % k == 0:
                return k
            k += align
    return None                 # no clean fold; fall back to tr = B (full row dim)


def _pick_tiles(num_rows: int, num_lanes: int, itemsize: int, pack: int,
                target_bytes: int, fixed_tr=None):
    """(row_tile, lane_tile) with ~target_bytes footprint, respecting (8,128) rule."""
    target_elems = max(128, target_bytes // itemsize)

    if fixed_tr is not None:
        tr = fixed_tr
    elif num_rows <= pack:
        tr = num_rows                            # == full dim -> legal
    else:
        tr = pack

    if num_lanes <= 128:
        tl = num_lanes                           # == full dim -> legal
    else:
        tl = min(num_lanes, max(128, target_elems // max(tr, 1)))
        tl = max(128, _round_down(tl, 128))

    # Lanes fully covered: spend leftover budget on more rows (fewer grid steps).
    if fixed_tr is None and num_rows > pack and tl >= num_lanes:
        tr = min(num_rows, max(pack, target_elems // max(tl, 1)))
        tr = max(pack, _round_down(tr, pack))

    return tr, tl


def _ensure_multi_block(num_rows, num_lanes, tr, tl, pack, fixed_tr):
    """v7x has 2 TensorCores sharing HBM: make sure the parallel grid has >=2 blocks."""
    if pl.cdiv(num_lanes, tl) * pl.cdiv(num_rows, tr) >= 2:
        return tr, tl
    if num_lanes >= 256:
        tl = max(128, _round_down(pl.cdiv(num_lanes, 2), 128))
    elif fixed_tr is None and num_rows >= 2 * pack:
        tr = max(pack, _round_down(num_rows // 2, pack))
    return tr, tl


# -------------------------------------------------------------------------- wrapper

def positional_encoder(x: jnp.ndarray, pe: jnp.ndarray, *,
                       min_pallas_elements: int = 256 * 1024,
                       tile_target_bytes: int = 4 << 20,
                       buffer_count: int = 2) -> jnp.ndarray:
    """x: [B, S, D]; pe: [max_seq_len, D]. Returns x + pe[:S] (eval-mode dropout)."""
    B, S, D = x.shape
    if S > pe.shape[0]:
        raise ValueError(f"seq_len {S} exceeds max_seq_len {pe.shape[0]}")

    out_dtype = jnp.result_type(x.dtype, pe.dtype)     # PyTorch promotion semantics
    pe_slice = pe[:S, :]

    # Tiny inputs: a bare broadcast-add is better left to XLA (fuses into neighbours).
    if B * S * D < min_pallas_elements:
        return (x + pe_slice[None, :, :]).astype(out_dtype)

    # Sublane pack for the densest dtype in flight (8 f32 / 16 bf16 / 32 int8).
    min_itemsize = min(jnp.dtype(x.dtype).itemsize, jnp.dtype(out_dtype).itemsize)
    pack = max(8, 32 // min_itemsize)

    # Layout: lane-dense flattened 2-D view. If B < pack, fold part of the sequence
    # into the row axis so stores use full sublane groups instead of masked B/8 vst.
    k = _choose_fold(B, S, pack)
    if k is None:
        rows, lanes = B, S * D
        x2 = x.reshape(rows, lanes)
        pe2 = pe_slice.reshape(1, lanes)
        pe_rows, fixed_tr = 1, None
    else:
        rows, lanes = B * k, (S // k) * D
        x2 = x.reshape(rows, lanes)
        pe2 = pe_slice.reshape(k, lanes)
        pe_rows, fixed_tr = k, k                     # row tile == k -> pe lines up exactly

    itemsize = max(jnp.dtype(x.dtype).itemsize, jnp.dtype(out_dtype).itemsize)
    vmem_cap = _vmem_capacity_bytes()
    target = max(256 * 1024, min(tile_target_bytes, vmem_cap // 12))

    tr, tl = _pick_tiles(rows, lanes, itemsize, pack, target, fixed_tr)
    if rows * lanes * itemsize >= (4 << 20):         # multi-MiB stream: feed both v7x TCs
        tr, tl = _ensure_multi_block(rows, lanes, tr, tl, pack, fixed_tr)

    # VMEM budget from *padded* block footprints, capped by the chip's capacity.
    n_buf = max(2, int(buffer_count))
    vmem_need = (n_buf * _padded_block_bytes(tr, tl, x.dtype)
                 + n_buf * _padded_block_bytes(tr, tl, out_dtype)
                 + 2 * _padded_block_bytes(pe_rows, tl, pe2.dtype))
    vmem_limit = min((vmem_cap * 3) // 4, max(16 << 20, vmem_need + (8 << 20)))
    vmem_limit = min(max(vmem_limit, vmem_need + (2 << 20)), vmem_cap)

    def xo_spec():
        if n_buf == 2:
            return pl.BlockSpec((tr, tl), lambda l, r: (r, l))
        return pl.BlockSpec((tr, tl), lambda l, r: (r, l),
                            pipeline_mode=pl.Buffered(n_buf))

    # Donate x into the output when dtypes match (same shape; x is dead after the add).
    io_alias = {0: 0} if out_dtype == x.dtype else {}

    # Grid: lane tiles outermost, rows innermost -> pe's block index is constant in the
    # inner axis, so pe is DMA'd once per lane tile (not once per grid step).
    out2 = pl.pallas_call(
        _pos_enc_kernel,
        out_shape=jax.ShapeDtypeStruct((rows, lanes), out_dtype),
        grid=(pl.cdiv(lanes, tl), pl.cdiv(rows, tr)),
        in_specs=[
            xo_spec(),                                          # x tile
            pl.BlockSpec((pe_rows, tl), lambda l, r: (0, l)),   # pe tile (row-broadcast)
        ],
        out_specs=xo_spec(),
        input_output_aliases=io_alias,
        compiler_params=pltpu.CompilerParams(
            dimension_semantics=("parallel", "parallel"),
            vmem_limit_bytes=int(vmem_limit),
        ),
    )(x2, pe2)

    return out2.reshape(B, S, D)


# ----------------------------------------------------------------------------- demo

if __name__ == "__main__":
    key = jax.random.PRNGKey(0)
    k1, k2, k3 = jax.random.split(key, 3)

    # Case 1: small module-like shape, forced through the Pallas path.
    # B < sublane pack -> exercises the sequence-fold layout ([B*k, (S/k)*D]).
    B1, S1, D1, L1 = 2, 8, 32, 64
    x1 = jax.random.normal(k1, (B1, S1, D1), dtype=jnp.float32)
    pe_a = make_positional_encoding(L1, D1)
    out1 = jax.block_until_ready(positional_encoder(x1, pe_a, min_pallas_elements=0))
    ref1 = x1 + pe_a[:S1][None]
    assert out1.shape == (B1, S1, D1) and out1.dtype == ref1.dtype
    assert jnp.allclose(out1, ref1, atol=1e-6, rtol=1e-6), "case 1 mismatch"

    # Case 2: B >= pack, small tile budget -> multi-block (lane, row) grid with pe reuse.
    B2, S2, D2, L2 = 16, 32, 64, 128
    x2 = jax.random.normal(k2, (B2, S2, D2), dtype=jnp.float32)
    pe_b = make_positional_encoding(L2, D2)
    out2 = jax.block_until_ready(positional_encoder(
        x2, pe_b, min_pallas_elements=0, tile_target_bytes=32 * 1024))
    ref2 = x2 + pe_b[:S2][None]
    assert out2.shape == (B2, S2, D2)
    assert jnp.allclose(out2, ref2, atol=1e-6, rtol=1e-6), "case 2 mismatch"

    # Case 3: bf16 activations + f32 pe -> f32 output (PyTorch promotion), 16-sublane
    # dtype-aware packing via the fold path, f32 accumulation in-kernel.
    B3, S3, D3, L3 = 4, 64, 32, 128
    x3 = jax.random.normal(k3, (B3, S3, D3), dtype=jnp.float32).astype(jnp.bfloat16)
    pe_c = make_positional_encoding(L3, D3)
    out3 = jax.block_until_ready(positional_encoder(x3, pe_c, min_pallas_elements=0))
    ref3 = x3 + pe_c[:S3][None]          # promotes bf16 -> f32, exactly like torch
    assert out3.dtype == jnp.float32
    assert jnp.allclose(out3, ref3, atol=1e-6, rtol=1e-6), "case 3 mismatch"

    print("KERNEL_OK")
</pallas_src>

<mosaic_0001>
module attributes {stable_mosaic.version = 11 : i64} {
  func.func @_pos_enc_kernel(%arg0: i32, %arg1: i32, %arg2: memref<8x32xf32, #tpu.memory_space<vmem>>, %arg3: memref<8x32xf32, #tpu.memory_space<vmem>>, %arg4: memref<8x32xf32, #tpu.memory_space<vmem>>) attributes {dimension_semantics = [#tpu.dimension_semantics<parallel>, #tpu.dimension_semantics<parallel>], iteration_bounds = array<i64: 1, 2>, scalar_prefetch = 0 : i64, scratch_operands = 0 : i64, tpu.core_type = #tpu.core_type<tc>, window_params = [{transform_indices = @transform_0, window_bounds = array<i64: 8, 32>}, {transform_indices = @transform_1, window_bounds = array<i64: 8, 32>}, {transform_indices = @transform_2, window_bounds = array<i64: 8, 32>}]} {
    %c0 = arith.constant 0 : index
    %c0_0 = arith.constant 0 : index
    %0 = vector.load %arg2[%c0, %c0_0] : memref<8x32xf32, #tpu.memory_space<vmem>>, vector<8x32xf32>
    %c0_1 = arith.constant 0 : index
    %c0_2 = arith.constant 0 : index
    %1 = vector.load %arg3[%c0_1, %c0_2] : memref<8x32xf32, #tpu.memory_space<vmem>>, vector<8x32xf32>
    %2 = arith.addf %0, %1 : vector<8x32xf32>
    %c0_3 = arith.constant 0 : index
    %c0_4 = arith.constant 0 : index
    %3 = vector.load %arg4[%c0_3, %c0_4] : memref<8x32xf32, #tpu.memory_space<vmem>>, vector<8x32xf32>
    tpu.vector_store %arg4[%c0_3, %c0_4], %2 {strides = array<i32>} : memref<8x32xf32, #tpu.memory_space<vmem>>, vector<8x32xf32>,
    return
  }
  func.func @transform_0(%arg0: i32, %arg1: i32) -> (i32, i32) {
    %c0_i32 = arith.constant 0 : i32
    return %arg1, %arg0 : i32, i32
  }
  func.func @transform_1(%arg0: i32, %arg1: i32) -> (i32, i32) {
    %c0_i32 = arith.constant 0 : i32
    %c0_i32_0 = arith.constant 0 : i32
    return %c0_i32, %arg0 : i32, i32
  }
  func.func @transform_2(%arg0: i32, %arg1: i32) -> (i32, i32) {
    %c0_i32 = arith.constant 0 : i32
    return %arg1, %arg0 : i32, i32
  }
}

</mosaic_0001>

<bundles_post_ra>
// kernel: tpu_custom_call.1
= control target key start
LH: loop header
LB: loop body
LE: loop exit
PB: predicated region body
PF: predicated region fallthrough
CT: control target
= control target key end

     0   :  { %7 = vsyncpa [#allocation3], 0  ;;  %s640_s0 = inlined_call_operand.hbm [shape: f32[16,32], index: 0, kind: input, shape index: {}, may-alias: {0,2}]   ;;  %s641_s1 = inlined_call_operand.vmem [shape: f32[8,32], index: 1, kind: input, shape index: {}]   ;;  %s642_s2 = inlined_call_operand.hbm [shape: f32[16,32], index: 2, kind: output, shape index: {}, may-alias: {0,2}]  }
   0x1   :  { %9 = vsyncpa [#allocation3 + $0x1], 0 }
   0x2   :  { %10 = vsyncpa [#allocation4], 0 }
   0x3   :  { %12 = vsyncpa [#allocation4 + $0x1], 0  ;;  %s517_s9 = smov 0   ;;  %s519_s10 = smov 0  }
   0x4   :  { %s521_s11 = smov 0   ;;  %s523_s12 = smov 0  }
   0x5   :  { %s525_s13 = smov 0   ;;  %s527_s14 = smov 0  }
   0x6 LB: > { %s312_s15 = sadd.s32 4294967295, %s500_s14   ;;  %s313_s16 = sadd.s32 4294967294, %s500_s14   ;;  %s500_s14 = sphi %s527_s14, %s18_s14   ;;  %s496_s13 = sphi %s525_s13, %s651_s13   ;;  %s492_s12 = sphi %s523_s12, %s650_s12   ;;  %s488_s11 = sphi %s521_s11, %s649_s11   ;;  %s484_s10 = sphi %s519_s10, %s648_s10   ;;  %s480_s9 = sphi %s517_s9, %s647_s9  }
   0x7   : > { %s27_s17 = sadd.s32 1, %s496_s13  ;;  %s39_s18 = sadd.s32 1, %s488_s11 }
   0x8   : > { %p28_p0 = scmp.ge.s32.totalorder %s27_s17, 2  ;;  %p46_p1 = scmp.ne.s32.totalorder %s488_s11, %s484_s10 }
   0x9   : > { %p47_p2 = scmp.eq.s32.totalorder %s500_s14, 0  ;;  %p52_p3 = scmp.ne.s32.totalorder %s484_s10, %s480_s9 }
   0xa   : > { %s653_s17 = smov (%p28_p0, %s27_s17), 0  ;;  %p53_p5 = scmp.eq.s32.totalorder %s312_s15, 0 }
   0xb   : > { %p558_p4 = por %p47_p2, %p46_p1  ;;  %s34_s20 = ssub.s32 %s496_s13, %s653_s17 }
   0xc   : > { %p104_p6 = scmp.eq.s32.totalorder %s312_s15, 1  ;;  %p37_p7 = scmp.eq.s32.totalorder %s34_s20, 0 }
   0xd   : > { %p564_p8 = por %p53_p5, %p52_p3  ;;  %p110_p10 = scmp.eq.s32.totalorder %s313_s16, 1 }
   0xe   : > { %p568_p9 = por %p104_p6, %p46_p1  ;;  %p316_p12 = scmp.ge.s32.totalorder %s500_s14, 2 }
   0xf   : > { %s573_s23 = scalar_select %p37_p7, %s488_s11, %s39_s18  }
  0x10   : > { %p575_p11 = por %p110_p10, %p52_p3  ;;  %p338_p13 = scmp.lt.s32.totalorder %s500_s14, 2 }
  0x11   : > { %s137_s25 = sand.u32 1, %s488_s11   ;;  %s318_s27 = sshll.u32 %s496_s13, 3 }
  0x12   : > { %s317_s26 = sshll.u32 %s137_s25, 3  ;;  %s146_s30 = scalar_lea.hbm %s640_s0, %s318_s27 }
  0x13   : > { %s141_s3 = scalar_lea.vmem [#allocation2], %s317_s26  ;;  %s148_s5 = sshll.u32 %s146_s30, 4  ;;  %s149_s5 = int_to_ptr.hbm [resolvable:$true] %s148_s5 }
  0x14   : > { %s150_s4 = sshll.u32 %s141_s3, 4  ;;  %p331_p0 = pnand %p338_p13, %p558_p4  ;;  %s151_s4 = int_to_ptr.vmem [resolvable:$true] %s150_s4 }
  0x15   : > { %p319_p1 = scmp.ge.s32.totalorder %s500_s14, 1  ;;  %p155_p2 = scmp.lt.s32.totalorder %s500_s14, 3 }
  0x16   : > { %s138_s6 = scalar_lea.sflag [#allocation3], %s137_s25 }
  0x17   : > { %333 = dma.hbm_to_vmem [thread:$0]  (!%p331_p0), %s149_s5, 128, %s151_s4, %s138_s6  }
  0x18   : > { %p156_p3 = pnand %p319_p1, %p155_p2 }
  0x19   : > { %s591_s7 = sand.u32 (!%p156_p3), 1, %s484_s10  }
  0x1a   : > { %159 = sbr.rel (%p156_p3) target bundleno = 47 (0x2f), region = 28  ;;  %s320_s8 = sshll.u32 (!%p156_p3), %s591_s7, 3 }
  0x1b   : > { %s162_s15 = scalar_lea.sflag (!%p156_p3), [#allocation3], %s591_s7  ;;  %s165_s16 = scalar_lea.vmem (!%p156_p3), [#allocation2], %s320_s8 }
  0x1f   : > { %471 = dma.done.wait (%p564_p8), %s162_s15, 128  }
  0x20   : > { %473 = vsyncadd (%p564_p8), %s162_s15, 4294967168  ;;  %s323_s18 = sshll.u32 %s492_s12, 3  ;;  %s190_s26 = scalar_lea.vmem [#allocation5], %s320_s8  ;;  %v195_v0 = vld [vmem:[%s165_s16] sm:$0xff]  ;;  %vm198_vm0 = vcmask 261120  }
  0x21   : > { %s212_s25 = scalar_lea.hbm %s642_s2, %s323_s18  ;;  %s214_s27 = sshll.u32 %s190_s26, 4  ;;  %v196_v1 = vld [vmem:[%s641_s1] sm:$0xff]  ;;  %s215_s27 = int_to_ptr.vmem [resolvable:$true] %s214_s27 }
  0x22   : > { %s216_s28 = sshll.u32 %s212_s25, 4  ;;  %v197_v2 = vadd.f32 %v196_v1, %v195_v0  ;;  %s201_s21 = scalar_lea.sflag [#allocation4], %s591_s7  ;;  %s217_s28 = int_to_ptr.hbm [resolvable:$true] %s216_s28 }
  0x23   : > { %s432_s12 = sshra.s32 %s217_s28, 4  ;;  %s438_s6 = scalar_lea.hbm %s642_s2, 16  ;;  %s433_s12 = int_to_ptr.hbm [resolvable:$true] %s432_s12 }
  0x24   : > { %199 = vst.msk [vmem:[%s190_s26] sm:$0xff] %vm198_vm0, %v197_v2  ;;  %s434_s3 = scalar_lea.hbm %s433_s12, 8  ;;  %p439_p7 = scmp.lt.s32.totalorder %s433_s12, %s642_s2 }
  0x25   : > { %p435_p4 = scmp.ne.s32.totalorder %s433_s12, %s434_s3  ;;  %p440_p8 = scmp.lt.s32.totalorder %s438_s6, %s434_s3 }
  0x27   : > { %p436_p5 = pnand %p435_p4, %p568_p9  ;;  %p441_p10 = por %p440_p8, %p439_p7 }
  0x29   : > { %p437_p6 = pneg %p436_p5 }
  0x2b   : > { %p442_p13 = pnand %p441_p10, %p437_p6 }
  0x2d   : > { %445 = shalt.err (!%p442_p13)
}
  0x2e   : > { %328 = dma.vmem_to_hbm [thread:$0]  (%p568_p9), %s215_s27, 128, %s217_s28, %s201_s21  }
  0x2f PF: > { %s228_s7 = sand.u32 1, %s480_s9   ;;  %p335_p0 = pnand %p316_p12, %p575_p11 }
  0x30   : > { %s229_s16 = scalar_lea.sflag [#allocation4], %s228_s7 }
  0x31   : > { %p336_p1 = pneg %p335_p0 }
  0x33   : > { %475 = dma.done.wait (%p336_p1), %s229_s16, 128  }
  0x34   : > { %477 = vsyncadd (%p336_p1), %s229_s16, 4294967168  ;;  %s18_s14 = sadd.s32 1, %s500_s14   ;;  %s647_s9 = smov %s484_s10 }
  0x35   : > { %p15_p2 = scmp.ge.s32.totalorder %s18_s14, 4   ;;  %s648_s10 = smov %s488_s11 }
  0x36   : > { %s649_s11 = smov %s573_s23  ;;  %s650_s12 = smov %s496_s13 }
  0x37   : > { %s651_s13 = smov %s653_s17  ;;  %17 = sbr.rel (!%p15_p2) target bundleno = 6 (0x6), region = 76 }
  0x3c   :  { %235 = vsyncpa [#allocation3], 1 }
  0x3d   :  { %237 = vsyncpa [#allocation3 + $0x1], 1 }
  0x3e   :  { %238 = vsyncpa [#allocation4], 1 }
  0x3f   :  { %240 = vsyncpa [#allocation4 + $0x1], 1 }

</bundles_post_ra>
